<compile_context>
chip_gen: v7x
topology: tpu7x:2x2x1
jax: 0.10.0
libtpu: 0.0.40
codegen_flags: <defaults>
</compile_context>

<pallas_src>
import math
import functools

import jax
import jax.numpy as jnp
from jax.experimental import pallas as pl
from jax.experimental.pallas import tpu as pltpu


def _fit(dim, target, mult=128):
    """Largest tile <= target that divides dim, preferring multiples of `mult`."""
    if dim <= target:
        return dim
    t = (target // mult) * mult
    while t >= mult:
        if dim % t == 0:
            return t
        t -= mult
    t = target
    while dim % t:
        t -= 1
    return max(t, 1)


# --------------------------------------------------------------------------
# Tiled linear (+ optional GELU epilogue).  bf16 in / bf16 out, f32 accumulate.
# --------------------------------------------------------------------------
def _linear_kernel(x_ref, w_ref, b_ref, o_ref, acc_ref, *, activation):
    @pl.when(pl.program_id(2) == 0)
    def _():
        acc_ref[...] = jnp.zeros_like(acc_ref)

    acc_ref[...] += jnp.dot(x_ref[...], w_ref[...],
                            preferred_element_type=jnp.float32)

    @pl.when(pl.program_id(2) == pl.num_programs(2) - 1)
    def _():
        y = acc_ref[...] + b_ref[...]
        if activation == "gelu":
            # exact (erf) GELU, matching HF BERT's "gelu"
            y = 0.5 * y * (1.0 + jax.lax.erf(y * (1.0 / math.sqrt(2.0))))
        o_ref[...] = y.astype(o_ref.dtype)


def pallas_linear(x2d, w, b, activation=None, out_dtype=jnp.bfloat16,
                  tm=512, tn=512, tk=768):
    M, K = x2d.shape
    N = w.shape[1]
    tm, tn, tk = _fit(M, tm), _fit(N, tn), _fit(K, tk)
    return pl.pallas_call(
        functools.partial(_linear_kernel, activation=activation),
        out_shape=jax.ShapeDtypeStruct((M, N), out_dtype),
        grid=(M // tm, N // tn, K // tk),
        in_specs=[
            pl.BlockSpec((tm, tk), lambda i, j, k: (i, k)),
            pl.BlockSpec((tk, tn), lambda i, j, k: (k, j)),
            pl.BlockSpec((1, tn), lambda i, j, k: (0, j)),
        ],
        out_specs=pl.BlockSpec((tm, tn), lambda i, j, k: (i, j)),
        scratch_shapes=[pltpu.VMEM((tm, tn), jnp.float32)],
        compiler_params=pltpu.CompilerParams(
            dimension_semantics=("parallel", "parallel", "arbitrary")),
    )(x2d, w, b.reshape(1, N))


# --------------------------------------------------------------------------
# Tiled linear fused with bias + residual-add + LayerNorm epilogue.
# N = hidden is kept untiled so the LN row statistics are local.
# --------------------------------------------------------------------------
def _linear_res_ln_kernel(x_ref, w_ref, b_ref, r_ref, g_ref, bet_ref,
                          o_ref, acc_ref):
    @pl.when(pl.program_id(1) == 0)
    def _():
        acc_ref[...] = jnp.zeros_like(acc_ref)

    acc_ref[...] += jnp.dot(x_ref[...], w_ref[...],
                            preferred_element_type=jnp.float32)

    @pl.when(pl.program_id(1) == pl.num_programs(1) - 1)
    def _():
        y = acc_ref[...] + b_ref[...] + r_ref[...].astype(jnp.float32)
        mean = jnp.mean(y, axis=-1, keepdims=True)
        var = jnp.mean((y - mean) ** 2, axis=-1, keepdims=True)
        out = (y - mean) * jax.lax.rsqrt(var + 1e-12) * g_ref[...] + bet_ref[...]
        o_ref[...] = out.astype(o_ref.dtype)


def pallas_linear_res_ln(x2d, w, b, residual, gamma, beta, tm=256, tk=768):
    M, K = x2d.shape
    H = w.shape[1]
    tm, tk = _fit(M, tm), _fit(K, tk)
    return pl.pallas_call(
        _linear_res_ln_kernel,
        out_shape=jax.ShapeDtypeStruct((M, H), jnp.bfloat16),
        grid=(M // tm, K // tk),
        in_specs=[
            pl.BlockSpec((tm, tk), lambda i, k: (i, k)),
            pl.BlockSpec((tk, H), lambda i, k: (k, 0)),
            pl.BlockSpec((1, H), lambda i, k: (0, 0)),
            pl.BlockSpec((tm, H), lambda i, k: (i, 0)),
            pl.BlockSpec((1, H), lambda i, k: (0, 0)),
            pl.BlockSpec((1, H), lambda i, k: (0, 0)),
        ],
        out_specs=pl.BlockSpec((tm, H), lambda i, k: (i, 0)),
        scratch_shapes=[pltpu.VMEM((tm, H), jnp.float32)],
        compiler_params=pltpu.CompilerParams(
            dimension_semantics=("parallel", "arbitrary")),
    )(x2d, w, b.reshape(1, H), residual, gamma.reshape(1, H), beta.reshape(1, H))


# --------------------------------------------------------------------------
# LayerNorm without residual (embedding LN) — row-tiled, f32 in, bf16 out.
# --------------------------------------------------------------------------
def _ln_kernel(x_ref, g_ref, b_ref, o_ref):
    x = x_ref[...].astype(jnp.float32)
    mean = jnp.mean(x, axis=-1, keepdims=True)
    var = jnp.mean((x - mean) ** 2, axis=-1, keepdims=True)
    out = (x - mean) * jax.lax.rsqrt(var + 1e-12) * g_ref[...] + b_ref[...]
    o_ref[...] = out.astype(o_ref.dtype)


def pallas_layernorm(x2d, gamma, beta, tm=512):
    M, H = x2d.shape
    tm = _fit(M, tm)
    return pl.pallas_call(
        _ln_kernel,
        out_shape=jax.ShapeDtypeStruct((M, H), jnp.bfloat16),
        grid=(M // tm,),
        in_specs=[
            pl.BlockSpec((tm, H), lambda i: (i, 0)),
            pl.BlockSpec((1, H), lambda i: (0, 0)),
            pl.BlockSpec((1, H), lambda i: (0, 0)),
        ],
        out_specs=pl.BlockSpec((tm, H), lambda i: (i, 0)),
        compiler_params=pltpu.CompilerParams(dimension_semantics=("parallel",)),
    )(x2d, gamma.reshape(1, H), beta.reshape(1, H))


# --------------------------------------------------------------------------
# Attention: grid = (batch, head, q_tile); head slicing is done by BlockSpec
# DMA on (B, nh, S, dh) q/k/v.  One (tq, S) f32 score tile live per step,
# softmax in f32, 1/sqrt(dh) folded into q, per-head direct output stores.
# --------------------------------------------------------------------------
def _attention_kernel(q_ref, k_ref, v_ref, bias_ref, o_ref, *, scale):
    q = q_ref[0, 0] * scale                       # (tq, dh) bf16, scale folded in
    k = k_ref[0, 0]                               # (S, dh)  bf16
    v = v_ref[0, 0]                               # (S, dh)  bf16
    s = jax.lax.dot_general(q, k, (((1,), (1,)), ((), ())),
                            preferred_element_type=jnp.float32)   # (tq, S)
    s = s + bias_ref[0]                           # (1, S) additive mask bias
    m = jnp.max(s, axis=-1, keepdims=True)
    p = jnp.exp(s - m)
    p = p * pl.reciprocal(jnp.sum(p, axis=-1, keepdims=True), approx=True)
    o_ref[0, 0] = jnp.dot(p.astype(jnp.bfloat16), v,
                          preferred_element_type=jnp.float32).astype(o_ref.dtype)


def pallas_attention(q, k, v, bias, tq=256):
    # q, k, v: (B, nh, S, dh) bf16     bias: (B, 1, S) f32
    B, nh, S, dh = q.shape
    tq = _fit(S, tq)
    kern = functools.partial(_attention_kernel, scale=1.0 / math.sqrt(dh))
    return pl.pallas_call(
        kern,
        out_shape=jax.ShapeDtypeStruct((B, nh, S, dh), jnp.bfloat16),
        grid=(B, nh, S // tq),
        in_specs=[
            pl.BlockSpec((1, 1, tq, dh), lambda b, h, qi: (b, h, qi, 0)),
            pl.BlockSpec((1, 1, S, dh), lambda b, h, qi: (b, h, 0, 0)),
            pl.BlockSpec((1, 1, S, dh), lambda b, h, qi: (b, h, 0, 0)),
            pl.BlockSpec((1, 1, S), lambda b, h, qi: (b, 0, 0)),
        ],
        out_specs=pl.BlockSpec((1, 1, tq, dh), lambda b, h, qi: (b, h, qi, 0)),
        compiler_params=pltpu.CompilerParams(
            dimension_semantics=("parallel", "parallel", "parallel")),
    )(q, k, v, bias)


# --------------------------------------------------------------------------
# Parameter init (deterministic, BERT-style N(0, 0.02)); matmul weights bf16.
# --------------------------------------------------------------------------
def init_params(key, cfg, tagset_size):
    H, I = cfg["hidden"], cfg["intermediate"]
    keys = iter(jax.random.split(key, 64))

    def w(shape):
        return (0.02 * jax.random.normal(next(keys), shape)).astype(jnp.bfloat16)

    def wf32(shape):
        return (0.02 * jax.random.normal(next(keys), shape)).astype(jnp.float32)

    def zeros(n):
        return jnp.zeros((n,), jnp.float32)

    def ones(n):
        return jnp.ones((n,), jnp.float32)

    # hidden2tag weight padded to a 128-lane output for dense stores
    n_pad = ((tagset_size + 127) // 128) * 128
    w_tag = wf32((H, tagset_size))
    w_tag_padded = jnp.zeros((H, n_pad), jnp.float32).at[:, :tagset_size].set(w_tag)

    params = {
        "word_emb": wf32((cfg["vocab"], H)),
        "pos_emb": wf32((cfg["max_pos"], H)),
        "type_emb": wf32((2, H)),
        "emb_ln_g": ones(H),
        "emb_ln_b": zeros(H),
        "layers": [],
        "w_tag": w_tag_padded.astype(jnp.bfloat16),
        "b_tag": zeros(n_pad),
        "n_tags": tagset_size,
    }
    for _ in range(cfg["layers"]):
        wq, wk, wv = w((H, H)), w((H, H)), w((H, H))
        params["layers"].append(
            {
                "w_qkv": jnp.concatenate([wq, wk, wv], axis=1),   # (H, 3H) bf16
                "b_qkv": zeros(3 * H),
                "wo": w((H, H)), "bo": zeros(H),
                "ln1_g": ones(H), "ln1_b": zeros(H),
                "w1": w((H, I)), "b1": zeros(I),
                "w2": w((I, H)), "b2": zeros(H),
                "ln2_g": ones(H), "ln2_b": zeros(H),
            }
        )
    return params


# --------------------------------------------------------------------------
# Forward pass (= BertPOSTagger.forward)
# --------------------------------------------------------------------------
def bert_pos_tagger_forward(params, input_ids, attention_mask, cfg):
    B, S = input_ids.shape
    H = cfg["hidden"]
    nh = cfg["heads"]
    dh = H // nh
    M = B * S

    # --- embeddings (gathers are plain-JAX glue) + embedding LayerNorm ------
    emb = (
        params["word_emb"][input_ids]
        + params["pos_emb"][jnp.arange(S)][None, :, :]
        + params["type_emb"][0][None, None, :]
    ).astype(jnp.float32)
    x2 = pallas_layernorm(emb.reshape(M, H), params["emb_ln_g"], params["emb_ln_b"])

    # --- extended attention-mask bias: (1 - mask) * -1e9, kept un-repeated --
    bias = ((1.0 - attention_mask.astype(jnp.float32)) * (-1e9)).reshape(B, 1, S)

    # --- transformer encoder layers ------------------------------------------
    for layer in params["layers"]:
        qkv = pallas_linear(x2, layer["w_qkv"], layer["b_qkv"])         # (M, 3H) bf16
        # layout plumbing so BlockSpec/DMA can slice heads inside the kernel
        qkv5 = qkv.reshape(B, S, 3, nh, dh).transpose(2, 0, 3, 1, 4)    # (3,B,nh,S,dh)
        ctx = pallas_attention(qkv5[0], qkv5[1], qkv5[2], bias)         # (B,nh,S,dh)
        ctx2 = ctx.transpose(0, 2, 1, 3).reshape(M, H)                  # (M, H) bf16
        x2 = pallas_linear_res_ln(ctx2, layer["wo"], layer["bo"],
                                  x2, layer["ln1_g"], layer["ln1_b"])
        ffn = pallas_linear(x2, layer["w1"], layer["b1"], activation="gelu")
        x2 = pallas_linear_res_ln(ffn, layer["w2"], layer["b2"],
                                  x2, layer["ln2_g"], layer["ln2_b"])

    # --- hidden2tag (lane-padded output, sliced back to tagset_size) --------
    tag_full = pallas_linear(x2, params["w_tag"], params["b_tag"],
                             out_dtype=jnp.float32)
    tag_scores = tag_full[:, : params["n_tags"]]
    return tag_scores.reshape(B, S, -1)


# --------------------------------------------------------------------------
if __name__ == "__main__":
    cfg = dict(vocab=64, hidden=32, layers=2, heads=2, intermediate=64, max_pos=16)
    tagset_size = 5
    B, S = 2, 8

    key = jax.random.PRNGKey(0)
    pkey, ikey = jax.random.split(key)
    params = init_params(pkey, cfg, tagset_size)

    input_ids = jax.random.randint(ikey, (B, S), 0, cfg["vocab"], dtype=jnp.int32)
    attention_mask = jnp.ones((B, S), dtype=jnp.int32)

    out = bert_pos_tagger_forward(params, input_ids, attention_mask, cfg)
    out = jax.block_until_ready(out)
    assert out.shape == (B, S, tagset_size)
    assert out.dtype == jnp.float32
    print("KERNEL_OK")
</pallas_src>

<mosaic_0001>
module attributes {stable_mosaic.version = 11 : i64} {
  func.func @_ln_kernel(%arg0: i32, %arg1: memref<16x32xf32, #tpu.memory_space<vmem>>, %arg2: memref<1x32xf32, #tpu.memory_space<vmem>>, %arg3: memref<1x32xf32, #tpu.memory_space<vmem>>, %arg4: memref<16x32xbf16, #tpu.memory_space<vmem>>) attributes {dimension_semantics = [#tpu.dimension_semantics<parallel>], iteration_bounds = array<i64: 1>, scalar_prefetch = 0 : i64, scratch_operands = 0 : i64, tpu.core_type = #tpu.core_type<tc>, window_params = [{transform_indices = @transform_0, window_bounds = array<i64: 16, 32>}, {pipeline_mode = #tpu.pipeline_mode<synchronous>, transform_indices = @transform_1, window_bounds = array<i64: 1, 32>}, {pipeline_mode = #tpu.pipeline_mode<synchronous>, transform_indices = @transform_2, window_bounds = array<i64: 1, 32>}, {transform_indices = @transform_3, window_bounds = array<i64: 16, 32>}]} {
    %c0 = arith.constant 0 : index
    %c0_0 = arith.constant 0 : index
    %0 = vector.load %arg1[%c0, %c0_0] : memref<16x32xf32, #tpu.memory_space<vmem>>, vector<16x32xf32>
    %cst = arith.constant dense<0.000000e+00> : vector<16xf32>
    %1 = vector.multi_reduction <add>, %0, %cst [1] : vector<16x32xf32> to vector<16xf32>
    %2 = vector.shape_cast %1 : vector<16xf32> to vector<16x1xf32>
    %cst_1 = arith.constant 3.200000e+01 : f32
    %3 = vector.broadcast %cst_1 : f32 to vector<16x1xf32>
    %4 = arith.divf %2, %3 : vector<16x1xf32>
    %5 = vector.broadcast %4 : vector<16x1xf32> to vector<16x32xf32>
    %6 = arith.subf %0, %5 : vector<16x32xf32>
    %7 = arith.mulf %6, %6 : vector<16x32xf32>
    %cst_2 = arith.constant dense<0.000000e+00> : vector<16xf32>
    %8 = vector.multi_reduction <add>, %7, %cst_2 [1] : vector<16x32xf32> to vector<16xf32>
    %9 = vector.shape_cast %8 : vector<16xf32> to vector<16x1xf32>
    %cst_3 = arith.constant 3.200000e+01 : f32
    %10 = vector.broadcast %cst_3 : f32 to vector<16x1xf32>
    %11 = arith.divf %9, %10 : vector<16x1xf32>
    %12 = vector.broadcast %4 : vector<16x1xf32> to vector<16x32xf32>
    %13 = arith.subf %0, %12 : vector<16x32xf32>
    %cst_4 = arith.constant 9.99999996E-13 : f32
    %14 = vector.broadcast %cst_4 : f32 to vector<16x1xf32>
    %15 = arith.addf %11, %14 : vector<16x1xf32>
    %16 = math.rsqrt %15 : vector<16x1xf32>
    %17 = vector.broadcast %16 : vector<16x1xf32> to vector<16x32xf32>
    %18 = arith.mulf %13, %17 : vector<16x32xf32>
    %c0_5 = arith.constant 0 : index
    %c0_6 = arith.constant 0 : index
    %19 = vector.load %arg2[%c0_5, %c0_6] : memref<1x32xf32, #tpu.memory_space<vmem>>, vector<1x32xf32>
    %20 = vector.broadcast %19 : vector<1x32xf32> to vector<16x32xf32>
    %21 = arith.mulf %18, %20 : vector<16x32xf32>
    %c0_7 = arith.constant 0 : index
    %c0_8 = arith.constant 0 : index
    %22 = vector.load %arg3[%c0_7, %c0_8] : memref<1x32xf32, #tpu.memory_space<vmem>>, vector<1x32xf32>
    %23 = vector.broadcast %22 : vector<1x32xf32> to vector<16x32xf32>
    %24 = arith.addf %21, %23 : vector<16x32xf32>
    %25 = arith.truncf %24 : vector<16x32xf32> to vector<16x32xbf16>
    %c0_9 = arith.constant 0 : index
    %c0_10 = arith.constant 0 : index
    %26 = vector.load %arg4[%c0_9, %c0_10] : memref<16x32xbf16, #tpu.memory_space<vmem>>, vector<16x32xbf16>
    tpu.vector_store %arg4[%c0_9, %c0_10], %25 {strides = array<i32>} : memref<16x32xbf16, #tpu.memory_space<vmem>>, vector<16x32xbf16>,
    return
  }
  func.func @transform_0(%arg0: i32) -> (i32, i32) {
    %c0_i32 = arith.constant 0 : i32
    %c0_i32_0 = arith.constant 0 : i32
    return %arg0, %c0_i32 : i32, i32
  }
  func.func @transform_1(%arg0: i32) -> (i32, i32) {
    %c0_i32 = arith.constant 0 : i32
    %c0_i32_0 = arith.constant 0 : i32
    %c0_i32_1 = arith.constant 0 : i32
    return %c0_i32, %c0_i32_0 : i32, i32
  }
  func.func @transform_2(%arg0: i32) -> (i32, i32) {
    %c0_i32 = arith.constant 0 : i32
    %c0_i32_0 = arith.constant 0 : i32
    %c0_i32_1 = arith.constant 0 : i32
    return %c0_i32, %c0_i32_0 : i32, i32
  }
  func.func @transform_3(%arg0: i32) -> (i32, i32) {
    %c0_i32 = arith.constant 0 : i32
    %c0_i32_0 = arith.constant 0 : i32
    return %arg0, %c0_i32 : i32, i32
  }
}

</mosaic_0001>

<bundles_post_ra>
// kernel: tpu_custom_call.1
= control target key start
LH: loop header
LB: loop body
LE: loop exit
PB: predicated region body
PF: predicated region fallthrough
CT: control target
= control target key end

     0   :  { %8 = vsyncpa [#allocation3], 0  ;;  %s229_s0 = inlined_call_operand.hbm [shape: f32[16,32], index: 0, kind: input, shape index: {}]   ;;  %s230_s1 = inlined_call_operand.vmem [shape: f32[1,32], index: 1, kind: input, shape index: {}]   ;;  %s231_s2 = inlined_call_operand.vmem [shape: f32[1,32], index: 2, kind: input, shape index: {}]   ;;  %s232_s3 = inlined_call_operand.hbm [shape: bf16[16,32], index: 3, kind: output, shape index: {}]  }
   0x1   :  { %9 = vsyncpa [#allocation4], 0  ;;  %s169_s12 = smov [#allocation2]   ;;  %s121_s16 = scalar_lea.hbm %s229_s0, 256 }
   0x2   :  { %s15_s13 = sshll.u32 %s169_s12, 4  ;;  %p122_p0 = scmp.ne.s32.totalorder %s229_s0, %s121_s16  ;;  %s16_s13 = int_to_ptr.vmem [resolvable:$true] %s15_s13 }
   0x3   :  { %p125_p1 = scmp.lt.u32.totalorder %s121_s16, %s229_s0 }
   0x5   :  { %p127_p2 = pnand %p125_p1, %p122_p0 }
   0x7   :  { %130 = shalt.err (!%p127_p2)
}
   0x8   :  { %s131_s21 = scalar_lea.vmem %s16_s13, 256  ;;  %p136_p4 = scmp.lt.s32.totalorder %s16_s13, %s16_s13 }
   0x9   :  { %p132_p3 = scmp.ne.s32.totalorder %s16_s13, %s131_s21  ;;  %p137_p5 = scmp.lt.s32.totalorder %s131_s21, %s131_s21 }
   0xb   :  { %p138_p6 = por %p137_p5, %p136_p4 }
   0xd   :  { %p139_p7 = pnand %p138_p6, %p132_p3 }
   0xf   :  { %142 = shalt.err (!%p139_p7)
}
  0x10   :  { %s170_s22 = smov 128   ;;  %s171_s23 = smov 8  }
  0x11   :  { %21 = dma.hbm_to_vmem [thread:$0]  %s229_s0, 256, %s16_s13, [#allocation3], %s170_s22, %s170_s22, %s171_s23  }
  0x12   :  { %165 = dma.done.wait [#allocation3], 256  }
  0x13   :  { %166 = vsyncadd [#allocation3], 4294967040  ;;  %vm31_vm0 = vcmask 261120   ;;  %v29_v0 = vld [vmem:[#allocation2] sm:$0xff]  ;;  %v30_v1 = vld [vmem:[#allocation2 + $0x8] sm:$0xff]  ;;  %vm85_vm1 = vcmask 257024  }
  0x14   :  { %v32_v2 = vsel %vm31_vm0, %v29_v0, 0.0  ;;  %v35_v3 = vsel %vm31_vm0, %v30_v1, 0.0  ;;  %v105_v21 = vld [vmem:[%s230_s1] ss:$0 sm:$0xff]  ;;  %s172_s29 = smov [#allocation5]  }
  0x15   :  { %33 = vadd.xlane.f32.xlu0 %v32_v2  ;;  %v106_v23 = vld [vmem:[%s231_s2] ss:$0 sm:$0xff]  ;;  %s93_s30 = sshll.u32 %s172_s29, 4  ;;  %s94_s30 = int_to_ptr.vmem [resolvable:$true] %s93_s30 }
  0x16   :  { %s143_s1 = scalar_lea.vmem %s94_s30, 128  ;;  %p148_p9 = scmp.lt.s32.totalorder %s94_s30, %s94_s30 }
  0x17   :  { %p144_p8 = scmp.ne.s32.totalorder %s94_s30, %s143_s1  ;;  %p149_p10 = scmp.lt.s32.totalorder %s143_s1, %s143_s1 }
  0x19   :  { %36 = vadd.xlane.f32.xlu0 %v35_v3  ;;  %p150_p11 = por %p149_p10, %p148_p9 }
  0x1b   :  { %p151_p12 = pnand %p150_p11, %p144_p8 }
  0xa2   :  { %v34_v4 = vpop.xlane.xlu0 %33 }
  0xa3   :  { %v39_v5 = vmul.f32 0.03125, %v34_v4 }
  0xa5   :  { %v41_v6 = vsub.f32 %v29_v0, %v39_v5 }
  0xa6   :  { %v37_v7 = vpop.xlane.xlu0 %36 }
  0xa7   :  { %v40_v8 = vmul.f32 0.03125, %v37_v7  ;;  %v43_v9 = vmul.f32 %v41_v6, %v41_v6 }
  0xa9   :  { %v42_v10 = vsub.f32 %v30_v1, %v40_v8  ;;  %v45_v11 = vsel %vm31_vm0, %v43_v9, 0.0 }
  0xaa   :  { %46 = vadd.xlane.f32.xlu1 %v45_v11 }
  0xab   :  { %v44_v12 = vmul.f32 %v42_v10, %v42_v10 }
  0xad   :  { %v48_v13 = vsel %vm31_vm0, %v44_v12, 0.0 }
  0xae   :  { %49 = vadd.xlane.f32.xlu1 %v48_v13 }
 0x137   :  { %v47_v14 = vpop.xlane.xlu1 %46 }
 0x138   :  { %v51_v15 = vmul.f32 0.03125, %v47_v14 }
 0x13a   :  { %v53_v16 = vadd.f32 1e-12, %v51_v15 }
 0x13b   :  { %v50_v17 = vpop.xlane.xlu1 %49 }
 0x13c   :  { %117 = vrsqrt.f32 %v53_v16  ;;  %v52_v18 = vmul.f32 0.03125, %v50_v17 }
 0x13e   :  { %v54_v19 = vadd.f32 1e-12, %v52_v18 }
 0x140   :  { %119 = vrsqrt.f32 %v54_v19 }
 0x146   :  { %v118_v20 = vpop.eup %117 }
 0x147   :  { %v57_v22 = vmul.f32 %v118_v20, %v41_v6 }
 0x149   :  { %v66_v24 = vmul.f32 %v105_v21, %v57_v22 }
 0x14a   :  { %v120_v25 = vpop.eup %119 }
 0x14b   :  { %v58_v26 = vmul.f32 %v120_v25, %v42_v10  ;;  %v75_v27 = vadd.f32 %v106_v23, %v66_v24 }
 0x14d   :  { %v67_v28 = vmul.f32 %v105_v21, %v58_v26  ;;  %v109_v29 = vpack.c.bf16 %v75_v27, %v75_v27 }
 0x14f   :  { %v76_v30 = vadd.f32 %v106_v23, %v67_v28  ;;  %86 = vst.msk [vmem:[#allocation5] sm:$0xf] %vm85_vm1, %v109_v29 }
 0x151   :  { %v110_v31 = vpack.c.bf16 %v76_v30, %v76_v30 }
 0x153   :  { %87 = vst.msk [vmem:[#allocation5 + $0x4] sm:$0xf] %vm85_vm1, %v110_v31 }
 0x154   :  { %154 = shalt.err (!%p151_p12)
}
 0x155   :  { %s155_s5 = scalar_lea.hbm %s232_s3, 128 }
 0x156   :  { %p156_p13 = scmp.ne.s32.totalorder %s232_s3, %s155_s5  ;;  %p159_p0 = scmp.lt.u32.totalorder %s155_s5, %s232_s3 }
 0x158   :  { %p161_p1 = pnand %p159_p0, %p156_p13 }
 0x15a   :  { %164 = shalt.err (!%p161_p1)
}
 0x15b   :  { %s173_s10 = smov 64   ;;  %s174_s11 = smov 4  }
 0x15c   :  { %99 = dma.vmem_to_hbm [thread:$0]  %s94_s30, 128, %s232_s3, [#allocation4], %s173_s10, %s173_s10, %s174_s11  }
 0x15d   :  { %167 = dma.done.wait [#allocation4], 128  }
 0x15e   :  { %168 = vsyncadd [#allocation4], 4294967168 }
 0x15f   :  { %103 = vsyncpa [#allocation3], 1 }
 0x160   :  { %104 = vsyncpa [#allocation4], 1 }

</bundles_post_ra>
